<compile_context>
chip_gen: v7x
topology: tpu7x:2x2x1
jax: 0.10.0
libtpu: 0.0.40
codegen_flags: <defaults>
</compile_context>

<pallas_src>
import functools

import jax
import jax.numpy as jnp
import numpy as np
from jax import lax
from jax.experimental import pallas as pl
from jax.experimental.pallas import tpu as pltpu

BN_EPS = 1e-5
LANES = 128


def _round8(n):
    return ((n + 7) // 8) * 8


def _full_spec(shape):
    # whole-array block (no grid; everything fits comfortably in VMEM at these shapes)
    return pl.BlockSpec(shape, lambda: (0,) * len(shape))


# ------------------------- parameter init (matches torch MLP) -------------------------

def init_mlp(key, input_dim, hidden_dim, output_dim, num_layers):
    """Init matching PyTorch MLP shapes; Linear weights stored (in, out)."""
    if num_layers < 1:
        raise ValueError("number of layers should be positive!")
    if num_layers == 1:
        dims = [(input_dim, output_dim)]
    else:
        dims = ([(input_dim, hidden_dim)]
                + [(hidden_dim, hidden_dim)] * (num_layers - 2)
                + [(hidden_dim, output_dim)])
    linears = []
    for din, dout in dims:
        key, kw, kb = jax.random.split(key, 3)
        bound = float(din) ** -0.5
        w = jax.random.uniform(kw, (din, dout), jnp.float32, -bound, bound)
        b = jax.random.uniform(kb, (1, dout), jnp.float32, -bound, bound)
        linears.append((w, b))
    bns = [(jnp.ones((1, hidden_dim), jnp.float32),
            jnp.zeros((1, hidden_dim), jnp.float32))
           for _ in range(num_layers - 1)]
    return {"linears": linears, "bns": bns}


def merge_encoder_params(pc, ps):
    """Exactly merge encoder_c / encoder_s into one wider MLP.

    Layer 0 concatenates outputs (shared input x); deeper layers are block-diagonal so
    the two streams never mix.  Per-column BN stats are identical to the separate MLPs.
    """
    linears = []
    n = len(pc["linears"])
    for i in range(n):
        wc, bc = pc["linears"][i]
        ws, bs = ps["linears"][i]
        if i == 0:
            w = jnp.concatenate([wc, ws], axis=1)
        else:
            top = jnp.concatenate([wc, jnp.zeros((wc.shape[0], ws.shape[1]), wc.dtype)], axis=1)
            bot = jnp.concatenate([jnp.zeros((ws.shape[0], wc.shape[1]), ws.dtype), ws], axis=1)
            w = jnp.concatenate([top, bot], axis=0)
        b = jnp.concatenate([bc, bs], axis=1)
        linears.append((w, b))
    bns = []
    for i in range(n - 1):
        gc, bec = pc["bns"][i]
        gs, bes = ps["bns"][i]
        bns.append((jnp.concatenate([gc, gs], axis=1),
                    jnp.concatenate([bec, bes], axis=1)))
    return {"linears": linears, "bns": bns}


def init_dis_model(key, input_dim, hidden_dim, output_dim, enc_layer, dec_layer, dis_layer):
    k1, k2, k3, k4 = jax.random.split(key, 4)
    enc_c = init_mlp(k1, input_dim, hidden_dim, output_dim, enc_layer)
    enc_s = init_mlp(k2, input_dim, hidden_dim, output_dim, enc_layer)
    return {
        "enc": merge_encoder_params(enc_c, enc_s),               # merged [enc_c | enc_s]
        "dec": init_mlp(k3, 2 * output_dim, hidden_dim, input_dim, dec_layer),
        "dis": init_mlp(k4, input_dim, hidden_dim, 1, dis_layer),
    }


# -------------------------- host-side parameter slab packing --------------------------

def pack_dis_model_params(params, batch_norm=True, lanes=LANES):
    """Pack every parameter of all three MLPs into ONE f32 (R, lanes) slab.

    Row offsets are 8-aligned; the layout (static Python ints) is captured by the kernel
    closure and used for zero-cost static ref slices in VMEM.  Done once, outside jit.
    """
    segments = []
    row = [0]

    def add_tensor(arr):
        a = np.asarray(arr, np.float32)
        r, c = a.shape
        pr = _round8(r)
        seg = np.zeros((pr, lanes), np.float32)
        seg[:r, :c] = a
        segments.append(seg)
        off = row[0]
        row[0] += pr
        return (off, r, c)

    def pack_mlp(mlp, vpu_head=False):
        lin = mlp["linears"]
        bns = mlp.get("bns", [])
        layers = []
        n = len(lin)
        for i in range(n):
            w, b = lin[i]
            last = (i == n - 1)
            din, dout = int(w.shape[0]), int(w.shape[1])
            use_vpu = bool(vpu_head and last and dout == 1)
            d = {"din": din, "dout": dout, "vpu_head": use_vpu}
            # width-1 discriminator head is stored pre-transposed as a (1, din) lane row
            d["w"] = add_tensor(np.asarray(w).T if use_vpu else w)
            d["b"] = add_tensor(b)
            if (not last) and batch_norm:
                g, beta = bns[i]
                d["g"] = add_tensor(g)
                d["beta"] = add_tensor(beta)
            layers.append(d)
        return layers

    layout = {
        "batch_norm": bool(batch_norm),
        "enc": pack_mlp(params["enc"]),
        "dec": pack_mlp(params["dec"]),
        "dis": pack_mlp(params["dis"], vpu_head=True),
    }
    slab = jnp.asarray(np.concatenate(segments, axis=0))
    return slab, layout


# ----------------------------- in-kernel MLP helpers ----------------------------------

def _ld(slab_ref, spec):
    off, r, c = spec
    return slab_ref[off:off + r, :c]          # static slice -> cheap masked VMEM load


def _bn_stats(y, halves, half_rows):
    """Training-mode BN stats (biased var).  halves==2 -> two independent BN batches
    stacked along the sublane axis; stats are computed per half so numerics match two
    separate passes exactly."""
    if halves == 1:
        mean = jnp.mean(y, axis=0, keepdims=True)
        var = jnp.maximum(jnp.mean(y * y, axis=0, keepdims=True) - mean * mean, 0.0)
        return mean, var
    row = lax.broadcasted_iota(jnp.int32, y.shape, 0)
    first = row < half_rows
    inv = 1.0 / half_rows
    y1 = jnp.where(first, y, 0.0)
    y2 = y - y1
    m1 = jnp.sum(y1, axis=0, keepdims=True) * inv
    m2 = jnp.sum(y2, axis=0, keepdims=True) * inv
    v1 = jnp.maximum(jnp.sum(y1 * y1, axis=0, keepdims=True) * inv - m1 * m1, 0.0)
    v2 = jnp.maximum(jnp.sum(y2 * y2, axis=0, keepdims=True) * inv - m2 * m2, 0.0)
    return jnp.where(first, m1, m2), jnp.where(first, v1, v2)


def _run_mlp_slab(h, slab_ref, layers, batch_norm, halves, half_rows):
    """MLP forward with params sliced from the packed slab.  Matmuls accumulate in f32
    on the MXU; BN/ReLU fused on the VPU/EUP; width-1 head on the VPU/XLU."""
    n = len(layers)
    for i, d in enumerate(layers):
        last = (i == n - 1)
        b = _ld(slab_ref, d["b"])
        if last and d["vpu_head"]:
            w_row = _ld(slab_ref, d["w"])                          # (1, din) pre-transposed
            y = jnp.sum(h * w_row, axis=-1, keepdims=True) + b     # no MXU push for 1 lane
        else:
            w = _ld(slab_ref, d["w"])                              # (din, dout)
            y = jnp.dot(h, w, preferred_element_type=jnp.float32) + b
        if last:
            return y
        if batch_norm:
            mean, var = _bn_stats(y, halves, half_rows)
            y = (y - mean) * lax.rsqrt(var + BN_EPS) * _ld(slab_ref, d["g"]) \
                + _ld(slab_ref, d["beta"])
        h = jnp.maximum(y, 0.0)
    return h


def _bce(z, label_is_one):
    # numerically-stable BCE-with-logits per element
    base = jnp.maximum(z, 0.0) + jnp.log1p(jnp.exp(-jnp.abs(z)))
    return base - z if label_is_one else base


# ----------------------------- fused forward kernel ------------------------------------

def _make_fused_kernel(layout, out_dim, batch):
    bn = layout["batch_norm"]
    enc_l, dec_l, dis_l = layout["enc"], layout["dec"], layout["dis"]
    B = batch

    def kernel(x_ref, s_pad_ref, slab_ref, enc_out_ref, loss_ref):
        x = x_ref[...]                        # (B, Din)
        s_pad = s_pad_ref[...]                # (B, 2*out_dim): [zeros | s]

        # merged encoders on x -> enc_out = [X_c | X_s]
        enc_out = _run_mlp_slab(x, slab_ref, enc_l, bn, 1, B)
        enc_out_ref[...] = enc_out

        # [X_c | s] via lane-iota select (no in-kernel lane slicing/concat)
        lane = lax.broadcasted_iota(jnp.int32, enc_out.shape, 1)
        is_c = lane < out_dim
        cs_noise = jnp.where(is_c, enc_out, s_pad)

        # fused twin decoder pass: rows [0,B)=dec([Xc|Xs]), [B,2B)=dec([Xc|s]); per-half BN
        dec_out = _run_mlp_slab(jnp.concatenate([enc_out, cs_noise], axis=0),
                                slab_ref, dec_l, bn, 2, B)
        x_rec = dec_out[:B]
        dec_noise = dec_out[B:]

        # re-encode dec_noise -> enc2 = [X_c_rec | X_s_rec]
        enc2 = _run_mlp_slab(dec_noise, slab_ref, enc_l, bn, 1, B)

        # reconstruction losses (mean reductions fused here)
        dx = x_rec - x
        loss_rx = jnp.sum(dx * dx) * (1.0 / dx.size)

        diff = enc2 - cs_noise                # [Xc_rec - Xc | Xs_rec - s]
        dsq = diff * diff
        sum_all = jnp.sum(dsq)
        sum_c = jnp.sum(jnp.where(is_c, dsq, 0.0))
        inv_half = 1.0 / (B * out_dim)
        loss_rc = sum_c * inv_half
        loss_rs = (sum_all - sum_c) * inv_half

        # fused twin discriminator pass: rows [0,B)=dis(x), [B,2B)=dis(dec_noise)
        logits = _run_mlp_slab(jnp.concatenate([x, dec_noise], axis=0),
                               slab_ref, dis_l, bn, 2, B)
        out_pos = logits[:B]
        out_neg = logits[B:]   # forward of dis(dec_noise.detach()) == dis(dec_noise)

        loss_dis = (jnp.sum(_bce(out_pos, True)) + jnp.sum(_bce(out_neg, False))) \
            * (1.0 / (2 * B))
        loss_gen = jnp.sum(_bce(out_neg, True)) * (1.0 / B)

        # packed scalar outputs [gen, rec_x, rec_c, rec_s, dis]
        loss_ref[0, 0] = loss_gen
        loss_ref[0, 1] = loss_rx
        loss_ref[0, 2] = loss_rc
        loss_ref[0, 3] = loss_rs
        loss_ref[0, 4] = loss_dis

    return kernel


def _cost_estimate(layout, batch, bytes_in, bytes_out):
    flops = 0
    trans = 0
    for name in ("enc", "dec", "dis"):
        rows = 2 * batch        # enc: two B-row passes; dec/dis: one stacked 2B-row pass
        for d in layout[name]:
            flops += 2 * rows * d["din"] * d["dout"] + 10 * rows * d["dout"]
            trans += d["dout"]  # ~one rsqrt per BN column
    trans += 6 * batch          # exp/log1p in the BCE terms
    return pl.CostEstimate(flops=int(flops), transcendentals=int(trans),
                           bytes_accessed=int(bytes_in + bytes_out))


# ----------------------------- DisModel forward -----------------------------------------

def dis_model_forward(slab, x, noise_key, *, layout):
    B, _ = x.shape
    out_dim = layout["dec"][0]["din"] // 2    # decoder input dim = 2*output_dim

    # s = randn_like(X_s), pre-padded into the [X_c | s] layout (first half zeros)
    s = jax.random.normal(noise_key, (B, out_dim), x.dtype)
    s_pad = jnp.concatenate([jnp.zeros_like(s), s], axis=1)

    kernel = _make_fused_kernel(layout, out_dim, B)

    smem = pl.BlockSpec(memory_space=pltpu.MemorySpace.SMEM)
    out_shape = (jax.ShapeDtypeStruct((B, 2 * out_dim), jnp.float32),
                 jax.ShapeDtypeStruct((1, 8), jnp.float32))
    bytes_in = 4 * (x.size + s_pad.size + slab.size)
    bytes_out = 4 * (B * 2 * out_dim + 8)

    enc_out, losses = pl.pallas_call(
        kernel,
        out_shape=out_shape,
        in_specs=[_full_spec(x.shape), _full_spec(s_pad.shape), _full_spec(slab.shape)],
        out_specs=(_full_spec((B, 2 * out_dim)), smem),
        cost_estimate=_cost_estimate(layout, B, bytes_in, bytes_out),
    )(x, s_pad, slab)

    X_c = enc_out[:, :out_dim]
    X_s = enc_out[:, out_dim:]
    return (X_c, X_s, losses[0, 0], losses[0, 1], losses[0, 2],
            losses[0, 3], losses[0, 4])


# ----------------------------- main ------------------------------------------------------

if __name__ == "__main__":
    # small shapes consistent with the module
    batch, input_dim, hidden_dim, output_dim = 8, 32, 32, 16
    enc_layer = dec_layer = dis_layer = 2

    root = jax.random.PRNGKey(0)
    k_params, k_x, k_noise = jax.random.split(root, 3)

    params = init_dis_model(k_params, input_dim, hidden_dim, output_dim,
                            enc_layer, dec_layer, dis_layer)
    slab, layout = pack_dis_model_params(params, batch_norm=True)
    x = jax.random.normal(k_x, (batch, input_dim), jnp.float32)

    fwd = jax.jit(functools.partial(dis_model_forward, layout=layout))
    outs = fwd(slab, x, k_noise)
    outs = jax.block_until_ready(outs)

    X_c, X_s, loss_gen, loss_rx, loss_rc, loss_rs, loss_disc = outs
    assert X_c.shape == (batch, output_dim) and X_s.shape == (batch, output_dim)
    for v in (loss_gen, loss_rx, loss_rc, loss_rs, loss_disc):
        assert v.shape == () and bool(jnp.isfinite(v))
    print("KERNEL_OK")
</pallas_src>

<mosaic_0001>
module attributes {stable_mosaic.version = 11 : i64} {
  func.func @kernel(%arg0: memref<8x32xf32, #tpu.memory_space<vmem>>, %arg1: memref<8x32xf32, #tpu.memory_space<vmem>>, %arg2: memref<296x128xf32, #tpu.memory_space<vmem>>, %arg3: memref<8x32xf32, #tpu.memory_space<vmem>>, %arg4: memref<1x8xf32, #tpu.memory_space<smem>>) attributes {dimension_semantics = [], scalar_prefetch = 0 : i64, scratch_operands = 0 : i64, tpu.core_type = #tpu.core_type<tc>} {
    %c0 = arith.constant 0 : index
    %c0_0 = arith.constant 0 : index
    %0 = vector.load %arg0[%c0, %c0_0] : memref<8x32xf32, #tpu.memory_space<vmem>>, vector<8x32xf32>
    %c0_1 = arith.constant 0 : index
    %c0_2 = arith.constant 0 : index
    %1 = vector.load %arg1[%c0_1, %c0_2] : memref<8x32xf32, #tpu.memory_space<vmem>>, vector<8x32xf32>
    %c32 = arith.constant 32 : index
    %c0_3 = arith.constant 0 : index
    %2 = vector.load %arg2[%c32, %c0_3] : memref<296x128xf32, #tpu.memory_space<vmem>>, vector<1x64xf32>
    %c0_4 = arith.constant 0 : index
    %c0_5 = arith.constant 0 : index
    %3 = vector.load %arg2[%c0_4, %c0_5] : memref<296x128xf32, #tpu.memory_space<vmem>>, vector<32x64xf32>
    %cst = arith.constant dense<0.000000e+00> : vector<8x64xf32>
    %4 = tpu.matmul %0, %3, %cst {dimension_numbers = #tpu.dot_dimension_numbers<[1], [0], [0], [1], [0, 0, 1, 1], [], []>} : vector<8x32xf32>, vector<32x64xf32>, vector<8x64xf32> -> vector<8x64xf32>
    %5 = vector.broadcast %2 : vector<1x64xf32> to vector<8x64xf32>
    %6 = arith.addf %4, %5 : vector<8x64xf32>
    %cst_6 = arith.constant dense<0.000000e+00> : vector<64xf32>
    %7 = vector.multi_reduction <add>, %6, %cst_6 [0] : vector<8x64xf32> to vector<64xf32>
    %8 = vector.shape_cast %7 : vector<64xf32> to vector<1x64xf32>
    %cst_7 = arith.constant 8.000000e+00 : f32
    %9 = vector.broadcast %cst_7 : f32 to vector<1x64xf32>
    %10 = arith.divf %8, %9 : vector<1x64xf32>
    %11 = arith.mulf %6, %6 : vector<8x64xf32>
    %cst_8 = arith.constant dense<0.000000e+00> : vector<64xf32>
    %12 = vector.multi_reduction <add>, %11, %cst_8 [0] : vector<8x64xf32> to vector<64xf32>
    %13 = vector.shape_cast %12 : vector<64xf32> to vector<1x64xf32>
    %cst_9 = arith.constant 8.000000e+00 : f32
    %14 = vector.broadcast %cst_9 : f32 to vector<1x64xf32>
    %15 = arith.divf %13, %14 : vector<1x64xf32>
    %16 = arith.mulf %10, %10 : vector<1x64xf32>
    %17 = arith.subf %15, %16 : vector<1x64xf32>
    %cst_10 = arith.constant 0.000000e+00 : f32
    %18 = vector.broadcast %cst_10 : f32 to vector<1x64xf32>
    %19 = arith.maximumf %17, %18 : vector<1x64xf32>
    %20 = vector.broadcast %10 : vector<1x64xf32> to vector<8x64xf32>
    %21 = arith.subf %6, %20 : vector<8x64xf32>
    %cst_11 = arith.constant 9.99999974E-6 : f32
    %22 = vector.broadcast %cst_11 : f32 to vector<1x64xf32>
    %23 = arith.addf %19, %22 : vector<1x64xf32>
    %24 = math.rsqrt %23 : vector<1x64xf32>
    %25 = vector.broadcast %24 : vector<1x64xf32> to vector<8x64xf32>
    %26 = arith.mulf %21, %25 : vector<8x64xf32>
    %c40 = arith.constant 40 : index
    %c0_12 = arith.constant 0 : index
    %27 = vector.load %arg2[%c40, %c0_12] : memref<296x128xf32, #tpu.memory_space<vmem>>, vector<1x64xf32>
    %28 = vector.broadcast %27 : vector<1x64xf32> to vector<8x64xf32>
    %29 = arith.mulf %26, %28 : vector<8x64xf32>
    %c48 = arith.constant 48 : index
    %c0_13 = arith.constant 0 : index
    %30 = vector.load %arg2[%c48, %c0_13] : memref<296x128xf32, #tpu.memory_space<vmem>>, vector<1x64xf32>
    %31 = vector.broadcast %30 : vector<1x64xf32> to vector<8x64xf32>
    %32 = arith.addf %29, %31 : vector<8x64xf32>
    %cst_14 = arith.constant 0.000000e+00 : f32
    %33 = vector.broadcast %cst_14 : f32 to vector<8x64xf32>
    %34 = arith.maximumf %32, %33 : vector<8x64xf32>
    %c120 = arith.constant 120 : index
    %c0_15 = arith.constant 0 : index
    %35 = vector.load %arg2[%c120, %c0_15] : memref<296x128xf32, #tpu.memory_space<vmem>>, vector<1x32xf32>
    %c56 = arith.constant 56 : index
    %c0_16 = arith.constant 0 : index
    %36 = vector.load %arg2[%c56, %c0_16] : memref<296x128xf32, #tpu.memory_space<vmem>>, vector<64x32xf32>
    %cst_17 = arith.constant dense<0.000000e+00> : vector<8x32xf32>
    %37 = tpu.matmul %34, %36, %cst_17 {dimension_numbers = #tpu.dot_dimension_numbers<[1], [0], [0], [1], [0, 0, 1, 1], [], []>} : vector<8x64xf32>, vector<64x32xf32>, vector<8x32xf32> -> vector<8x32xf32>
    %38 = vector.broadcast %35 : vector<1x32xf32> to vector<8x32xf32>
    %39 = arith.addf %37, %38 : vector<8x32xf32>
    %c0_18 = arith.constant 0 : index
    %c0_19 = arith.constant 0 : index
    %40 = vector.load %arg3[%c0_18, %c0_19] : memref<8x32xf32, #tpu.memory_space<vmem>>, vector<8x32xf32>
    tpu.vector_store %arg3[%c0_18, %c0_19], %39 {strides = array<i32>} : memref<8x32xf32, #tpu.memory_space<vmem>>, vector<8x32xf32>,
    %41 = tpu.iota {dimensions = array<i32: 1>} : vector<8x32xi32>
    %c16_i32 = arith.constant 16 : i32
    %42 = vector.broadcast %c16_i32 : i32 to vector<8x32xi32>
    %43 = arith.cmpi slt, %41, %42 : vector<8x32xi32>
    %44 = arith.select %43, %39, %1 : vector<8x32xi1>, vector<8x32xf32>
    %45 = tpu.concatenate %39, %44 in 0 : vector<8x32xf32>, vector<8x32xf32> -> vector<16x32xf32>
    %c160 = arith.constant 160 : index
    %c0_20 = arith.constant 0 : index
    %46 = vector.load %arg2[%c160, %c0_20] : memref<296x128xf32, #tpu.memory_space<vmem>>, vector<1x32xf32>
    %c128 = arith.constant 128 : index
    %c0_21 = arith.constant 0 : index
    %47 = vector.load %arg2[%c128, %c0_21] : memref<296x128xf32, #tpu.memory_space<vmem>>, vector<32x32xf32>
    %cst_22 = arith.constant dense<0.000000e+00> : vector<16x32xf32>
    %48 = tpu.matmul %45, %47, %cst_22 {dimension_numbers = #tpu.dot_dimension_numbers<[1], [0], [0], [1], [0, 0, 1, 1], [], []>} : vector<16x32xf32>, vector<32x32xf32>, vector<16x32xf32> -> vector<16x32xf32>
    %49 = vector.broadcast %46 : vector<1x32xf32> to vector<16x32xf32>
    %50 = arith.addf %48, %49 : vector<16x32xf32>
    %51 = tpu.iota {dimensions = array<i32: 0>} : vector<16x32xi32>
    %c8_i32 = arith.constant 8 : i32
    %52 = vector.broadcast %c8_i32 : i32 to vector<16x32xi32>
    %53 = arith.cmpi slt, %51, %52 : vector<16x32xi32>
    %cst_23 = arith.constant 0.000000e+00 : f32
    %54 = vector.broadcast %cst_23 : f32 to vector<16x32xf32>
    %55 = arith.select %53, %50, %54 : vector<16x32xi1>, vector<16x32xf32>
    %56 = arith.subf %50, %55 : vector<16x32xf32>
    %cst_24 = arith.constant dense<0.000000e+00> : vector<32xf32>
    %57 = vector.multi_reduction <add>, %55, %cst_24 [0] : vector<16x32xf32> to vector<32xf32>
    %58 = vector.shape_cast %57 : vector<32xf32> to vector<1x32xf32>
    %cst_25 = arith.constant 1.250000e-01 : f32
    %59 = vector.broadcast %cst_25 : f32 to vector<1x32xf32>
    %60 = arith.mulf %58, %59 : vector<1x32xf32>
    %cst_26 = arith.constant dense<0.000000e+00> : vector<32xf32>
    %61 = vector.multi_reduction <add>, %56, %cst_26 [0] : vector<16x32xf32> to vector<32xf32>
    %62 = vector.shape_cast %61 : vector<32xf32> to vector<1x32xf32>
    %cst_27 = arith.constant 1.250000e-01 : f32
    %63 = vector.broadcast %cst_27 : f32 to vector<1x32xf32>
    %64 = arith.mulf %62, %63 : vector<1x32xf32>
    %65 = arith.mulf %55, %55 : vector<16x32xf32>
    %cst_28 = arith.constant dense<0.000000e+00> : vector<32xf32>
    %66 = vector.multi_reduction <add>, %65, %cst_28 [0] : vector<16x32xf32> to vector<32xf32>
    %67 = vector.shape_cast %66 : vector<32xf32> to vector<1x32xf32>
    %cst_29 = arith.constant 1.250000e-01 : f32
    %68 = vector.broadcast %cst_29 : f32 to vector<1x32xf32>
    %69 = arith.mulf %67, %68 : vector<1x32xf32>
    %70 = arith.mulf %60, %60 : vector<1x32xf32>
    %71 = arith.subf %69, %70 : vector<1x32xf32>
    %cst_30 = arith.constant 0.000000e+00 : f32
    %72 = vector.broadcast %cst_30 : f32 to vector<1x32xf32>
    %73 = arith.maximumf %71, %72 : vector<1x32xf32>
    %74 = arith.mulf %56, %56 : vector<16x32xf32>
    %cst_31 = arith.constant dense<0.000000e+00> : vector<32xf32>
    %75 = vector.multi_reduction <add>, %74, %cst_31 [0] : vector<16x32xf32> to vector<32xf32>
    %76 = vector.shape_cast %75 : vector<32xf32> to vector<1x32xf32>
    %cst_32 = arith.constant 1.250000e-01 : f32
    %77 = vector.broadcast %cst_32 : f32 to vector<1x32xf32>
    %78 = arith.mulf %76, %77 : vector<1x32xf32>
    %79 = arith.mulf %64, %64 : vector<1x32xf32>
    %80 = arith.subf %78, %79 : vector<1x32xf32>
    %cst_33 = arith.constant 0.000000e+00 : f32
    %81 = vector.broadcast %cst_33 : f32 to vector<1x32xf32>
    %82 = arith.maximumf %80, %81 : vector<1x32xf32>
    %83 = vector.shape_cast %60 : vector<1x32xf32> to vector<1x32xf32>
    %84 = vector.broadcast %83 : vector<1x32xf32> to vector<16x32xf32>
    %85 = vector.shape_cast %64 : vector<1x32xf32> to vector<1x32xf32>
    %86 = vector.broadcast %85 : vector<1x32xf32> to vector<16x32xf32>
    %87 = arith.select %53, %84, %86 : vector<16x32xi1>, vector<16x32xf32>
    %88 = vector.shape_cast %73 : vector<1x32xf32> to vector<1x32xf32>
    %89 = vector.broadcast %88 : vector<1x32xf32> to vector<16x32xf32>
    %90 = vector.shape_cast %82 : vector<1x32xf32> to vector<1x32xf32>
    %91 = vector.broadcast %90 : vector<1x32xf32> to vector<16x32xf32>
    %92 = arith.select %53, %89, %91 : vector<16x32xi1>, vector<16x32xf32>
    %93 = arith.subf %50, %87 : vector<16x32xf32>
    %cst_34 = arith.constant 9.99999974E-6 : f32
    %94 = vector.broadcast %cst_34 : f32 to vector<16x32xf32>
    %95 = arith.addf %92, %94 : vector<16x32xf32>
    %96 = math.rsqrt %95 : vector<16x32xf32>
    %97 = arith.mulf %93, %96 : vector<16x32xf32>
    %c168 = arith.constant 168 : index
    %c0_35 = arith.constant 0 : index
    %98 = vector.load %arg2[%c168, %c0_35] : memref<296x128xf32, #tpu.memory_space<vmem>>, vector<1x32xf32>
    %99 = vector.broadcast %98 : vector<1x32xf32> to vector<16x32xf32>
    %100 = arith.mulf %97, %99 : vector<16x32xf32>
    %c176 = arith.constant 176 : index
    %c0_36 = arith.constant 0 : index
    %101 = vector.load %arg2[%c176, %c0_36] : memref<296x128xf32, #tpu.memory_space<vmem>>, vector<1x32xf32>
    %102 = vector.broadcast %101 : vector<1x32xf32> to vector<16x32xf32>
    %103 = arith.addf %100, %102 : vector<16x32xf32>
    %cst_37 = arith.constant 0.000000e+00 : f32
    %104 = vector.broadcast %cst_37 : f32 to vector<16x32xf32>
    %105 = arith.maximumf %103, %104 : vector<16x32xf32>
    %c216 = arith.constant 216 : index
    %c0_38 = arith.constant 0 : index
    %106 = vector.load %arg2[%c216, %c0_38] : memref<296x128xf32, #tpu.memory_space<vmem>>, vector<1x32xf32>
    %c184 = arith.constant 184 : index
    %c0_39 = arith.constant 0 : index
    %107 = vector.load %arg2[%c184, %c0_39] : memref<296x128xf32, #tpu.memory_space<vmem>>, vector<32x32xf32>
    %cst_40 = arith.constant dense<0.000000e+00> : vector<16x32xf32>
    %108 = tpu.matmul %105, %107, %cst_40 {dimension_numbers = #tpu.dot_dimension_numbers<[1], [0], [0], [1], [0, 0, 1, 1], [], []>} : vector<16x32xf32>, vector<32x32xf32>, vector<16x32xf32> -> vector<16x32xf32>
    %109 = vector.broadcast %106 : vector<1x32xf32> to vector<16x32xf32>
    %110 = arith.addf %108, %109 : vector<16x32xf32>
    %111 = vector.extract_strided_slice %110 {offsets = [0, 0], sizes = [8, 32], strides = [1, 1]} : vector<16x32xf32> to vector<8x32xf32>
    %112 = vector.extract_strided_slice %110 {offsets = [8, 0], sizes = [8, 32], strides = [1, 1]} : vector<16x32xf32> to vector<8x32xf32>
    %c32_41 = arith.constant 32 : index
    %c0_42 = arith.constant 0 : index
    %113 = vector.load %arg2[%c32_41, %c0_42] : memref<296x128xf32, #tpu.memory_space<vmem>>, vector<1x64xf32>
    %c0_43 = arith.constant 0 : index
    %c0_44 = arith.constant 0 : index
    %114 = vector.load %arg2[%c0_43, %c0_44] : memref<296x128xf32, #tpu.memory_space<vmem>>, vector<32x64xf32>
    %cst_45 = arith.constant dense<0.000000e+00> : vector<8x64xf32>
    %115 = tpu.matmul %112, %114, %cst_45 {dimension_numbers = #tpu.dot_dimension_numbers<[1], [0], [0], [1], [0, 0, 1, 1], [], []>} : vector<8x32xf32>, vector<32x64xf32>, vector<8x64xf32> -> vector<8x64xf32>
    %116 = vector.broadcast %113 : vector<1x64xf32> to vector<8x64xf32>
    %117 = arith.addf %115, %116 : vector<8x64xf32>
    %cst_46 = arith.constant dense<0.000000e+00> : vector<64xf32>
    %118 = vector.multi_reduction <add>, %117, %cst_46 [0] : vector<8x64xf32> to vector<64xf32>
    %119 = vector.shape_cast %118 : vector<64xf32> to vector<1x64xf32>
    %cst_47 = arith.constant 8.000000e+00 : f32
    %120 = vector.broadcast %cst_47 : f32 to vector<1x64xf32>
    %121 = arith.divf %119, %120 : vector<1x64xf32>
    %122 = arith.mulf %117, %117 : vector<8x64xf32>
    %cst_48 = arith.constant dense<0.000000e+00> : vector<64xf32>
    %123 = vector.multi_reduction <add>, %122, %cst_48 [0] : vector<8x64xf32> to vector<64xf32>
    %124 = vector.shape_cast %123 : vector<64xf32> to vector<1x64xf32>
    %cst_49 = arith.constant 8.000000e+00 : f32
    %125 = vector.broadcast %cst_49 : f32 to vector<1x64xf32>
    %126 = arith.divf %124, %125 : vector<1x64xf32>
    %127 = arith.mulf %121, %121 : vector<1x64xf32>
    %128 = arith.subf %126, %127 : vector<1x64xf32>
    %cst_50 = arith.constant 0.000000e+00 : f32
    %129 = vector.broadcast %cst_50 : f32 to vector<1x64xf32>
    %130 = arith.maximumf %128, %129 : vector<1x64xf32>
    %131 = vector.broadcast %121 : vector<1x64xf32> to vector<8x64xf32>
    %132 = arith.subf %117, %131 : vector<8x64xf32>
    %cst_51 = arith.constant 9.99999974E-6 : f32
    %133 = vector.broadcast %cst_51 : f32 to vector<1x64xf32>
    %134 = arith.addf %130, %133 : vector<1x64xf32>
    %135 = math.rsqrt %134 : vector<1x64xf32>
    %136 = vector.broadcast %135 : vector<1x64xf32> to vector<8x64xf32>
    %137 = arith.mulf %132, %136 : vector<8x64xf32>
    %c40_52 = arith.constant 40 : index
    %c0_53 = arith.constant 0 : index
    %138 = vector.load %arg2[%c40_52, %c0_53] : memref<296x128xf32, #tpu.memory_space<vmem>>, vector<1x64xf32>
    %139 = vector.broadcast %138 : vector<1x64xf32> to vector<8x64xf32>
    %140 = arith.mulf %137, %139 : vector<8x64xf32>
    %c48_54 = arith.constant 48 : index
    %c0_55 = arith.constant 0 : index
    %141 = vector.load %arg2[%c48_54, %c0_55] : memref<296x128xf32, #tpu.memory_space<vmem>>, vector<1x64xf32>
    %142 = vector.broadcast %141 : vector<1x64xf32> to vector<8x64xf32>
    %143 = arith.addf %140, %142 : vector<8x64xf32>
    %cst_56 = arith.constant 0.000000e+00 : f32
    %144 = vector.broadcast %cst_56 : f32 to vector<8x64xf32>
    %145 = arith.maximumf %143, %144 : vector<8x64xf32>
    %c120_57 = arith.constant 120 : index
    %c0_58 = arith.constant 0 : index
    %146 = vector.load %arg2[%c120_57, %c0_58] : memref<296x128xf32, #tpu.memory_space<vmem>>, vector<1x32xf32>
    %c56_59 = arith.constant 56 : index
    %c0_60 = arith.constant 0 : index
    %147 = vector.load %arg2[%c56_59, %c0_60] : memref<296x128xf32, #tpu.memory_space<vmem>>, vector<64x32xf32>
    %cst_61 = arith.constant dense<0.000000e+00> : vector<8x32xf32>
    %148 = tpu.matmul %145, %147, %cst_61 {dimension_numbers = #tpu.dot_dimension_numbers<[1], [0], [0], [1], [0, 0, 1, 1], [], []>} : vector<8x64xf32>, vector<64x32xf32>, vector<8x32xf32> -> vector<8x32xf32>
    %149 = vector.broadcast %146 : vector<1x32xf32> to vector<8x32xf32>
    %150 = arith.addf %148, %149 : vector<8x32xf32>
    %151 = arith.subf %111, %0 : vector<8x32xf32>
    %152 = arith.mulf %151, %151 : vector<8x32xf32>
    %153 = vector.shape_cast %152 : vector<8x32xf32> to vector<1x8x32xf32>
    %cst_62 = arith.constant dense<0.000000e+00> : vector<1xf32>
    %154 = vector.multi_reduction <add>, %153, %cst_62 [1, 2] : vector<1x8x32xf32> to vector<1xf32>
    %155 = vector.shape_cast %154 : vector<1xf32> to vector<1x1x1xf32>
    %156 = vector.extract %155[0, 0, 0] : f32 from vector<1x1x1xf32>
    %cst_63 = arith.constant 3.906250e-03 : f32
    %157 = arith.mulf %156, %cst_63 : f32
    %158 = arith.subf %150, %44 : vector<8x32xf32>
    %159 = arith.mulf %158, %158 : vector<8x32xf32>
    %160 = vector.shape_cast %159 : vector<8x32xf32> to vector<1x8x32xf32>
    %cst_64 = arith.constant dense<0.000000e+00> : vector<1xf32>
    %161 = vector.multi_reduction <add>, %160, %cst_64 [1, 2] : vector<1x8x32xf32> to vector<1xf32>
    %162 = vector.shape_cast %161 : vector<1xf32> to vector<1x1x1xf32>
    %163 = vector.extract %162[0, 0, 0] : f32 from vector<1x1x1xf32>
    %cst_65 = arith.constant 0.000000e+00 : f32
    %164 = vector.broadcast %cst_65 : f32 to vector<8x32xf32>
    %165 = arith.select %43, %159, %164 : vector<8x32xi1>, vector<8x32xf32>
    %166 = vector.shape_cast %165 : vector<8x32xf32> to vector<1x8x32xf32>
    %cst_66 = arith.constant dense<0.000000e+00> : vector<1xf32>
    %167 = vector.multi_reduction <add>, %166, %cst_66 [1, 2] : vector<1x8x32xf32> to vector<1xf32>
    %168 = vector.shape_cast %167 : vector<1xf32> to vector<1x1x1xf32>
    %169 = vector.extract %168[0, 0, 0] : f32 from vector<1x1x1xf32>
    %cst_67 = arith.constant 7.812500e-03 : f32
    %170 = arith.mulf %169, %cst_67 : f32
    %171 = arith.subf %163, %169 : f32
    %cst_68 = arith.constant 7.812500e-03 : f32
    %172 = arith.mulf %171, %cst_68 : f32
    %173 = tpu.concatenate %0, %112 in 0 : vector<8x32xf32>, vector<8x32xf32> -> vector<16x32xf32>
    %c256 = arith.constant 256 : index
    %c0_69 = arith.constant 0 : index
    %174 = vector.load %arg2[%c256, %c0_69] : memref<296x128xf32, #tpu.memory_space<vmem>>, vector<1x32xf32>
    %c224 = arith.constant 224 : index
    %c0_70 = arith.constant 0 : index
    %175 = vector.load %arg2[%c224, %c0_70] : memref<296x128xf32, #tpu.memory_space<vmem>>, vector<32x32xf32>
    %cst_71 = arith.constant dense<0.000000e+00> : vector<16x32xf32>
    %176 = tpu.matmul %173, %175, %cst_71 {dimension_numbers = #tpu.dot_dimension_numbers<[1], [0], [0], [1], [0, 0, 1, 1], [], []>} : vector<16x32xf32>, vector<32x32xf32>, vector<16x32xf32> -> vector<16x32xf32>
    %177 = vector.broadcast %174 : vector<1x32xf32> to vector<16x32xf32>
    %178 = arith.addf %176, %177 : vector<16x32xf32>
    %179 = tpu.iota {dimensions = array<i32: 0>} : vector<16x32xi32>
    %c8_i32_72 = arith.constant 8 : i32
    %180 = vector.broadcast %c8_i32_72 : i32 to vector<16x32xi32>
    %181 = arith.cmpi slt, %179, %180 : vector<16x32xi32>
    %cst_73 = arith.constant 0.000000e+00 : f32
    %182 = vector.broadcast %cst_73 : f32 to vector<16x32xf32>
    %183 = arith.select %181, %178, %182 : vector<16x32xi1>, vector<16x32xf32>
    %184 = arith.subf %178, %183 : vector<16x32xf32>
    %cst_74 = arith.constant dense<0.000000e+00> : vector<32xf32>
    %185 = vector.multi_reduction <add>, %183, %cst_74 [0] : vector<16x32xf32> to vector<32xf32>
    %186 = vector.shape_cast %185 : vector<32xf32> to vector<1x32xf32>
    %cst_75 = arith.constant 1.250000e-01 : f32
    %187 = vector.broadcast %cst_75 : f32 to vector<1x32xf32>
    %188 = arith.mulf %186, %187 : vector<1x32xf32>
    %cst_76 = arith.constant dense<0.000000e+00> : vector<32xf32>
    %189 = vector.multi_reduction <add>, %184, %cst_76 [0] : vector<16x32xf32> to vector<32xf32>
    %190 = vector.shape_cast %189 : vector<32xf32> to vector<1x32xf32>
    %cst_77 = arith.constant 1.250000e-01 : f32
    %191 = vector.broadcast %cst_77 : f32 to vector<1x32xf32>
    %192 = arith.mulf %190, %191 : vector<1x32xf32>
    %193 = arith.mulf %183, %183 : vector<16x32xf32>
    %cst_78 = arith.constant dense<0.000000e+00> : vector<32xf32>
    %194 = vector.multi_reduction <add>, %193, %cst_78 [0] : vector<16x32xf32> to vector<32xf32>
    %195 = vector.shape_cast %194 : vector<32xf32> to vector<1x32xf32>
    %cst_79 = arith.constant 1.250000e-01 : f32
    %196 = vector.broadcast %cst_79 : f32 to vector<1x32xf32>
    %197 = arith.mulf %195, %196 : vector<1x32xf32>
    %198 = arith.mulf %188, %188 : vector<1x32xf32>
    %199 = arith.subf %197, %198 : vector<1x32xf32>
    %cst_80 = arith.constant 0.000000e+00 : f32
    %200 = vector.broadcast %cst_80 : f32 to vector<1x32xf32>
    %201 = arith.maximumf %199, %200 : vector<1x32xf32>
    %202 = arith.mulf %184, %184 : vector<16x32xf32>
    %cst_81 = arith.constant dense<0.000000e+00> : vector<32xf32>
    %203 = vector.multi_reduction <add>, %202, %cst_81 [0] : vector<16x32xf32> to vector<32xf32>
    %204 = vector.shape_cast %203 : vector<32xf32> to vector<1x32xf32>
    %cst_82 = arith.constant 1.250000e-01 : f32
    %205 = vector.broadcast %cst_82 : f32 to vector<1x32xf32>
    %206 = arith.mulf %204, %205 : vector<1x32xf32>
    %207 = arith.mulf %192, %192 : vector<1x32xf32>
    %208 = arith.subf %206, %207 : vector<1x32xf32>
    %cst_83 = arith.constant 0.000000e+00 : f32
    %209 = vector.broadcast %cst_83 : f32 to vector<1x32xf32>
    %210 = arith.maximumf %208, %209 : vector<1x32xf32>
    %211 = vector.shape_cast %188 : vector<1x32xf32> to vector<1x32xf32>
    %212 = vector.broadcast %211 : vector<1x32xf32> to vector<16x32xf32>
    %213 = vector.shape_cast %192 : vector<1x32xf32> to vector<1x32xf32>
    %214 = vector.broadcast %213 : vector<1x32xf32> to vector<16x32xf32>
    %215 = arith.select %181, %212, %214 : vector<16x32xi1>, vector<16x32xf32>
    %216 = vector.shape_cast %201 : vector<1x32xf32> to vector<1x32xf32>
    %217 = vector.broadcast %216 : vector<1x32xf32> to vector<16x32xf32>
    %218 = vector.shape_cast %210 : vector<1x32xf32> to vector<1x32xf32>
    %219 = vector.broadcast %218 : vector<1x32xf32> to vector<16x32xf32>
    %220 = arith.select %181, %217, %219 : vector<16x32xi1>, vector<16x32xf32>
    %221 = arith.subf %178, %215 : vector<16x32xf32>
    %cst_84 = arith.constant 9.99999974E-6 : f32
    %222 = vector.broadcast %cst_84 : f32 to vector<16x32xf32>
    %223 = arith.addf %220, %222 : vector<16x32xf32>
    %224 = math.rsqrt %223 : vector<16x32xf32>
    %225 = arith.mulf %221, %224 : vector<16x32xf32>
    %c264 = arith.constant 264 : index
    %c0_85 = arith.constant 0 : index
    %226 = vector.load %arg2[%c264, %c0_85] : memref<296x128xf32, #tpu.memory_space<vmem>>, vector<1x32xf32>
    %227 = vector.broadcast %226 : vector<1x32xf32> to vector<16x32xf32>
    %228 = arith.mulf %225, %227 : vector<16x32xf32>
    %c272 = arith.constant 272 : index
    %c0_86 = arith.constant 0 : index
    %229 = vector.load %arg2[%c272, %c0_86] : memref<296x128xf32, #tpu.memory_space<vmem>>, vector<1x32xf32>
    %230 = vector.broadcast %229 : vector<1x32xf32> to vector<16x32xf32>
    %231 = arith.addf %228, %230 : vector<16x32xf32>
    %cst_87 = arith.constant 0.000000e+00 : f32
    %232 = vector.broadcast %cst_87 : f32 to vector<16x32xf32>
    %233 = arith.maximumf %231, %232 : vector<16x32xf32>
    %c288 = arith.constant 288 : index
    %c0_88 = arith.constant 0 : index
    %234 = vector.load %arg2[%c288, %c0_88] : memref<296x128xf32, #tpu.memory_space<vmem>>, vector<1x1xf32>
    %c280 = arith.constant 280 : index
    %c0_89 = arith.constant 0 : index
    %235 = vector.load %arg2[%c280, %c0_89] : memref<296x128xf32, #tpu.memory_space<vmem>>, vector<1x32xf32>
    %236 = vector.broadcast %235 : vector<1x32xf32> to vector<16x32xf32>
    %237 = arith.mulf %233, %236 : vector<16x32xf32>
    %cst_90 = arith.constant dense<0.000000e+00> : vector<16xf32>
    %238 = vector.multi_reduction <add>, %237, %cst_90 [1] : vector<16x32xf32> to vector<16xf32>
    %239 = vector.shape_cast %238 : vector<16xf32> to vector<16x1xf32>
    %240 = vector.broadcast %234 : vector<1x1xf32> to vector<16x1xf32>
    %241 = arith.addf %239, %240 : vector<16x1xf32>
    %242 = vector.extract_strided_slice %241 {offsets = [0, 0], sizes = [8, 1], strides = [1, 1]} : vector<16x1xf32> to vector<8x1xf32>
    %243 = vector.extract_strided_slice %241 {offsets = [8, 0], sizes = [8, 1], strides = [1, 1]} : vector<16x1xf32> to vector<8x1xf32>
    %cst_91 = arith.constant 0.000000e+00 : f32
    %244 = vector.broadcast %cst_91 : f32 to vector<8x1xf32>
    %245 = arith.maximumf %242, %244 : vector<8x1xf32>
    %246 = math.absf %242 : vector<8x1xf32>
    %cst_92 = arith.constant 0.000000e+00 : f32
    %247 = vector.broadcast %cst_92 : f32 to vector<8x1xf32>
    %248 = arith.subf %247, %246 : vector<8x1xf32>
    %249 = math.exp %248 : vector<8x1xf32>
    %250 = math.log1p %249 : vector<8x1xf32>
    %251 = arith.addf %245, %250 : vector<8x1xf32>
    %252 = arith.subf %251, %242 : vector<8x1xf32>
    %253 = vector.shape_cast %252 : vector<8x1xf32> to vector<1x8x1xf32>
    %cst_93 = arith.constant dense<0.000000e+00> : vector<1xf32>
    %254 = vector.multi_reduction <add>, %253, %cst_93 [1, 2] : vector<1x8x1xf32> to vector<1xf32>
    %255 = vector.shape_cast %254 : vector<1xf32> to vector<1x1x1xf32>
    %256 = vector.extract %255[0, 0, 0] : f32 from vector<1x1x1xf32>
    %cst_94 = arith.constant 0.000000e+00 : f32
    %257 = vector.broadcast %cst_94 : f32 to vector<8x1xf32>
    %258 = arith.maximumf %243, %257 : vector<8x1xf32>
    %259 = math.absf %243 : vector<8x1xf32>
    %cst_95 = arith.constant 0.000000e+00 : f32
    %260 = vector.broadcast %cst_95 : f32 to vector<8x1xf32>
    %261 = arith.subf %260, %259 : vector<8x1xf32>
    %262 = math.exp %261 : vector<8x1xf32>
    %263 = math.log1p %262 : vector<8x1xf32>
    %264 = arith.addf %258, %263 : vector<8x1xf32>
    %265 = vector.shape_cast %264 : vector<8x1xf32> to vector<1x8x1xf32>
    %cst_96 = arith.constant dense<0.000000e+00> : vector<1xf32>
    %266 = vector.multi_reduction <add>, %265, %cst_96 [1, 2] : vector<1x8x1xf32> to vector<1xf32>
    %267 = vector.shape_cast %266 : vector<1xf32> to vector<1x1x1xf32>
    %268 = vector.extract %267[0, 0, 0] : f32 from vector<1x1x1xf32>
    %269 = arith.addf %256, %268 : f32
    %cst_97 = arith.constant 6.250000e-02 : f32
    %270 = arith.mulf %269, %cst_97 : f32
    %cst_98 = arith.constant 0.000000e+00 : f32
    %271 = vector.broadcast %cst_98 : f32 to vector<8x1xf32>
    %272 = arith.maximumf %243, %271 : vector<8x1xf32>
    %273 = math.absf %243 : vector<8x1xf32>
    %cst_99 = arith.constant 0.000000e+00 : f32
    %274 = vector.broadcast %cst_99 : f32 to vector<8x1xf32>
    %275 = arith.subf %274, %273 : vector<8x1xf32>
    %276 = math.exp %275 : vector<8x1xf32>
    %277 = math.log1p %276 : vector<8x1xf32>
    %278 = arith.addf %272, %277 : vector<8x1xf32>
    %279 = arith.subf %278, %243 : vector<8x1xf32>
    %280 = vector.shape_cast %279 : vector<8x1xf32> to vector<1x8x1xf32>
    %cst_100 = arith.constant dense<0.000000e+00> : vector<1xf32>
    %281 = vector.multi_reduction <add>, %280, %cst_100 [1, 2] : vector<1x8x1xf32> to vector<1xf32>
    %282 = vector.shape_cast %281 : vector<1xf32> to vector<1x1x1xf32>
    %283 = vector.extract %282[0, 0, 0] : f32 from vector<1x1x1xf32>
    %cst_101 = arith.constant 1.250000e-01 : f32
    %284 = arith.mulf %283, %cst_101 : f32
    %c0_102 = arith.constant 0 : index
    %c0_103 = arith.constant 0 : index
    %285 = memref.load %arg4[%c0_102, %c0_103] : memref<1x8xf32, #tpu.memory_space<smem>>
    memref.store %284, %arg4[%c0_102, %c0_103] : memref<1x8xf32, #tpu.memory_space<smem>>
    %c0_104 = arith.constant 0 : index
    %c1 = arith.constant 1 : index
    %286 = memref.load %arg4[%c0_104, %c1] : memref<1x8xf32, #tpu.memory_space<smem>>
    memref.store %157, %arg4[%c0_104, %c1] : memref<1x8xf32, #tpu.memory_space<smem>>
    %c0_105 = arith.constant 0 : index
    %c2 = arith.constant 2 : index
    %287 = memref.load %arg4[%c0_105, %c2] : memref<1x8xf32, #tpu.memory_space<smem>>
    memref.store %170, %arg4[%c0_105, %c2] : memref<1x8xf32, #tpu.memory_space<smem>>
    %c0_106 = arith.constant 0 : index
    %c3 = arith.constant 3 : index
    %288 = memref.load %arg4[%c0_106, %c3] : memref<1x8xf32, #tpu.memory_space<smem>>
    memref.store %172, %arg4[%c0_106, %c3] : memref<1x8xf32, #tpu.memory_space<smem>>
    %c0_107 = arith.constant 0 : index
    %c4 = arith.constant 4 : index
    %289 = memref.load %arg4[%c0_107, %c4] : memref<1x8xf32, #tpu.memory_space<smem>>
    memref.store %270, %arg4[%c0_107, %c4] : memref<1x8xf32, #tpu.memory_space<smem>>
    return
  }
}

</mosaic_0001>

<bundles_post_ra>
// kernel: dis_model_forward.1
= control target key start
LH: loop header
LB: loop body
LE: loop exit
PB: predicated region body
PF: predicated region fallthrough
CT: control target
= control target key end

     0   :  { %10 = vsyncpa [#allocation3], 0  ;;  %s1529_s0 = inlined_call_operand.vmem [shape: f32[8,32], index: 0, kind: input, shape index: {}]   ;;  %s1530_s1 = inlined_call_operand.vmem [shape: f32[8,32], index: 1, kind: input, shape index: {}]   ;;  %s1531_s2 = inlined_call_operand.hbm [shape: f32[296,128], index: 2, kind: input, shape index: {}]   ;;  %s1532_s3 = inlined_call_operand.vmem [shape: f32[8,32], index: 3, kind: output, shape index: {0}]   ;;  %s1533_s4 = inlined_call_operand.vmem [shape: f32[1,8], index: 4, kind: output, shape index: {1}]  }
   0x1   :  { %11 = vsyncpa [#allocation4], 0  ;;  %s1342_s15 = smov [#allocation2]   ;;  %s1304_s19 = scalar_lea.hbm %s1531_s2, 4736 }
   0x2   :  { %s21_s16 = sshll.u32 %s1342_s15, 4  ;;  %p1305_p0 = scmp.ne.s32.totalorder %s1531_s2, %s1304_s19  ;;  %s22_s16 = int_to_ptr.vmem [resolvable:$true] %s21_s16 }
   0x3   :  { %p1308_p1 = scmp.lt.u32.totalorder %s1304_s19, %s1531_s2 }
   0x5   :  { %p1310_p2 = pnand %p1308_p1, %p1305_p0 }
   0x7   :  { %1313 = shalt.err (!%p1310_p2)
}
   0x8   :  { %s1314_s24 = scalar_lea.vmem %s22_s16, 4736  ;;  %p1319_p4 = scmp.lt.s32.totalorder %s22_s16, %s22_s16 }
   0x9   :  { %p1315_p3 = scmp.ne.s32.totalorder %s22_s16, %s1314_s24  ;;  %p1320_p5 = scmp.lt.s32.totalorder %s1314_s24, %s1314_s24 }
   0xb   :  { %p1321_p6 = por %p1320_p5, %p1319_p4 }
   0xd   :  { %p1322_p7 = pnand %p1321_p6, %p1315_p3 }
   0xf   :  { %1325 = shalt.err (!%p1322_p7)
}
  0x10   :  { %s1343_s25 = smov 128   ;;  %s1344_s26 = smov 8  }
  0x11   :  { %27 = dma.hbm_to_vmem [thread:$0]  %s1531_s2, 4736, %s22_s16, [#allocation3], %s1343_s25, %s1343_s25, %s1344_s26  }
  0x12   :  { %1338 = dma.done.wait [#allocation3], 4736  }
  0x13   :  { %1339 = vsyncadd [#allocation3], 4294962560  ;;  %v1345_v0 = vmov 0.0|0.0   ;;  %vm1346_vm0 = vmmov 0   ;;  %v1347_v1 = vmov 0.0   ;;  %v34_v2 = vld [vmem:[#allocation2] sm:$0xff]  ;;  %v242_v60 = vlaneseq }
  0x14   :  { %1205 = vmatprep.subr.bf16.mxu0 %v1345_v0  ;;  %1120 = vmatprep.mubr.msk.f32.mxu0 %vm1346_vm0, %v1347_v1  ;;  %v35_v3 = vld [vmem:[#allocation2 + $0x8] sm:$0xff]  ;;  %v36_v4 = vld [vmem:[#allocation2 + $0x10] sm:$0xff]  ;;  %v37_v6 = vld [vmem:[#allocation2 + $0x18] sm:$0xff]  ;;  %vm42_vm1 = vcmask 261120   ;;  %vm116_vm2 = vcmask 523264   ;;  %vm959_vm5 = vcmask 7168  }
  0x15   :  { %1211 = vmatprep.subr.bf16.mxu1 %v1345_v0  ;;  %1139 = vmatprep.mubr.msk.f32.mxu1 %vm1346_vm0, %v1347_v1  ;;  %v1392_v5 = vpack.c.bf16 %v35_v3, %v34_v2  ;;  %v1395_v7 = vpack.c.bf16 %v37_v6, %v36_v4  ;;  %v1402_v8 = vld [vmem:[%s1529_s0] sm:$0xff]  ;;  %v156_v9 = vld [vmem:[#allocation2 + $0x38] sm:$0xff]  ;;  %v158_v12 = vld [vmem:[#allocation2 + $0x48] sm:$0xff]  ;;  %v1439_v61 = vand.u32 127, %v242_v60  ;;  %s1027_s16 = sshll.u32 %s1533_s4, 4  ;;  %s1028_s16 = int_to_ptr.vmem [resolvable:$true] %s1027_s16 }
  0x16   :  { %v157_v10 = vld [vmem:[#allocation2 + $0x40] sm:$0xff]  ;;  %v159_v13 = vld [vmem:[#allocation2 + $0x50] sm:$0xff]  ;;  %v160_v15 = vld [vmem:[#allocation2 + $0x58] sm:$0xff]  ;;  %s1326_s21 = scalar_lea.vmem %s1028_s16, 16  ;;  %p1331_p9 = scmp.lt.s32.totalorder %s1028_s16, %s1028_s16 }
  0x17   :  { %1207 = vmatpush3.bf16.msra.mxu0 %v1392_v5  ;;  %v1406_v11 = vpack.c.bf16 %v157_v10, %v156_v9  ;;  %v1410_v14 = vpack.c.bf16 %v159_v13, %v158_v12  ;;  %v161_v16 = vld [vmem:[#allocation2 + $0x60] sm:$0xff]  ;;  %v162_v18 = vld [vmem:[#allocation2 + $0x68] sm:$0xff]  ;;  %v163_v19 = vld [vmem:[#allocation2 + $0x70] sm:$0xff]  ;;  %vm244_vm3 = vcmp.lt.s32.totalorder %v1439_v61, 16  ;;  %p1327_p8 = scmp.ne.s32.totalorder %s1028_s16, %s1326_s21  ;;  %p1332_p10 = scmp.lt.s32.totalorder %s1326_s21, %s1326_s21 }
  0x18   :  { %1208 = vmatprep.subr.bf16.mxu0 %v1345_v0  ;;  %v1414_v17 = vpack.c.bf16 %v161_v16, %v160_v15  ;;  %v1418_v20 = vpack.c.bf16 %v163_v19, %v162_v18  ;;  %v247_v21 = vld [vmem:[#allocation2 + $0x80] sm:$0xff]  ;;  %v248_v22 = vld [vmem:[#allocation2 + $0x88] sm:$0xff]  ;;  %v1429_v53 = vld [vmem:[#allocation2 + $0x30] ss:$0 sm:$0xff] }
  0x19   :  { %1213 = vmatpush3.bf16.msra.mxu1 %v1406_v11  ;;  %v1223_v23 = vpack.c.bf16 %v248_v22, %v247_v21  ;;  %v1422_v24 = vld [vmem:[#allocation2 + $0x20] ss:$0 sm:$0xff]  ;;  %v1427_v51 = vld [vmem:[#allocation2 + $0x28] ss:$0 sm:$0xff]  ;;  %v249_v57 = vld [vmem:[#allocation2 + $0x90] sm:$0xff]  ;;  %p1333_p11 = por %p1332_p10, %p1331_p9 }
  0x1a   :  { %1214 = vmatprep.subr.bf16.mxu1 %v1345_v0  ;;  %v250_v58 = vld [vmem:[#allocation2 + $0x98] sm:$0xff]  ;;  %v32_v63 = vld [vmem:[%s1530_s1] sm:$0xff]  ;;  %v426_v9 = vld [vmem:[#allocation2 + $0xc8] sm:$0xff] }
  0x1b   :  { %1210 = vmatpush3.bf16.msra.mxu0 %v1395_v7  ;;  %v1227_v59 = vpack.c.bf16 %v250_v58, %v249_v57  ;;  %v1441_v62 = vld [vmem:[#allocation2 + $0x78] ss:$0 sm:$0xff]  ;;  %v427_v12 = vld [vmem:[#allocation2 + $0xd0] sm:$0xff]  ;;  %v1045_v15 = vld [vmem:[#allocation2 + $0xa0] ss:$0 sm:$0xff]  ;;  %p1334_p12 = pnand %p1333_p11, %p1327_p8 }
  0x1c   :  { %1224 = vmatprep.subr.bf16.mxu0 %v1223_v23  ;;  %v424_v6 = vld [vmem:[#allocation2 + $0xb8] sm:$0xff]  ;;  %v1235_v13 = vpack.c.bf16 %v427_v12, %v426_v9 }
  0x1d   :  { %1216 = vmatpush3.bf16.msra.mxu1 %v1410_v14 }
  0x1e   :  { %1121 = vmatmul.mubr.msk.f32.vlgmr.msra.gmra.mrb[0].mxu0 %vm42_vm1, %v1402_v8  ;;  %1217 = vmatprep.subr.bf16.mxu1 %v1345_v0 }
  0x1f   :  { %1226 = vmatpush3.bf16.msra.mxu0 %v1223_v23 }
  0x20   :  { %1228 = vmatprep.subr.bf16.mxu0 %v1227_v59 }
  0x21   :  { %1219 = vmatpush3.bf16.msra.mxu1 %v1414_v17 }
  0x22   :  { %1220 = vmatprep.subr.bf16.mxu1 %v1345_v0 }
  0x23   :  { %1230 = vmatpush3.bf16.msra.mxu0 %v1227_v59 }
  0x25   :  { %1222 = vmatpush3.bf16.msra.mxu1 %v1418_v20 }
  0x26   :  { %1239 = vmatprep.subr.bf16.mxu1 %v1345_v0 }
  0xf1   :  { %v112_v25 = vpop.f32.mrb[0].mxu0 }
  0xf2   :  { %v113_v26 = vadd.f32 %v1422_v24, %v112_v25  ;;  %v1122_v27 = vpop.f32.mrb[1].mxu0 }
  0xf4   :  { %v117_v28 = vsel %vm116_vm2, %v113_v26, 0.0  ;;  %v126_v29 = vmul.f32 %v113_v26, %v113_v26 }
  0xf5   :  { %v118_v30 = vrot.slane %v117_v28, 4 }
  0xf6   :  { %v127_v31 = vsel %vm116_vm2, %v126_v29, 0.0 }
  0xf7   :  { %v119_v32 = vadd.f32 %v118_v30, %v117_v28  ;;  %v128_v33 = vrot.slane %v127_v31, 4 }
  0xf9   :  { %v120_v34 = vrot.slane %v119_v32, 2  ;;  %v129_v35 = vadd.f32 %v128_v33, %v127_v31 }
  0xfb   :  { %v121_v36 = vadd.f32 %v120_v34, %v119_v32  ;;  %v130_v37 = vrot.slane %v129_v35, 2 }
  0xfd   :  { %v122_v38 = vrot.slane %v121_v36, 1  ;;  %v131_v39 = vadd.f32 %v130_v37, %v129_v35 }
  0xff   :  { %v123_v40 = vadd.f32 %v122_v38, %v121_v36  ;;  %v132_v41 = vrot.slane %v131_v39, 1 }
 0x101   :  { %v125_v42 = vmul.f32 0.125, %v123_v40  ;;  %v133_v43 = vadd.f32 %v132_v41, %v131_v39 }
 0x103   :  { %v134_v44 = vmul.f32 0.125, %v133_v43  ;;  %v135_v45 = vmul.f32 %v125_v42, %v125_v42  ;;  %v138_v49 = vsub.f32 %v113_v26, %v125_v42 }
 0x105   :  { %v136_v46 = vsub.f32 %v134_v44, %v135_v45 }
 0x107   :  { %v137_v47 = vmax.f32 %v136_v46, 0.0 }
 0x109   :  { %v139_v48 = vadd.f32 1e-05, %v137_v47 }
 0x10b   :  { %1284 = vrsqrt.f32 %v139_v48 }
 0x115   :  { %v1285_v50 = vpop.eup %1284 }
 0x116   :  { %v141_v52 = vmul.f32 %v1285_v50, %v138_v49 }
 0x118   :  { %v147_v54 = vmul.f32 %v1427_v51, %v141_v52 }
 0x11a   :  { %v153_v55 = vadd.f32 %v1429_v53, %v147_v54 }
 0x11c   :  { %v154_v56 = vmax.f32 %v153_v55, 0.0 }
 0x11e   :  { %1140 = vmatmul.mubr.msk.f32.vlgmr.msra.gmra.mrb[0].mxu1 %vm116_vm2, %v154_v56 }
 0x11f   :  { %1241 = vmatpush3.bf16.msra.mxu1 %v1392_v5  ;;  %1172 = vmatprep.mubr.msk.f32.mxu1 %vm1346_vm0, %v1347_v1 }
 0x120   :  { %1242 = vmatprep.subr.bf16.mxu1 %v1345_v0 }
 0x123   :  { %1244 = vmatpush3.bf16.msra.mxu1 %v1395_v7  ;;  %v425_v7 = vld [vmem:[#allocation2 + $0xc0] sm:$0xff] }
 0x124   :  { %v1231_v10 = vpack.c.bf16 %v425_v7, %v424_v6 }
 0x126   :  { %1232 = vmatprep.subr.bf16.mxu0 %v1231_v10 }
 0x1f1   :  { %v237_v2 = vpop.f32.mrb[0].mxu1 }
 0x1f2   :  { %v238_v3 = vadd.f32 %v1441_v62, %v237_v2  ;;  %v1141_v4 = vpop.f32.mrb[1].mxu1 }
 0x1f4   :  { %241 = vst.msk [vmem:[%s1532_s3] sm:$0xff] %vm42_vm1, %v238_v3  ;;  %v1454_v5 = vsel %vm244_vm3, %v238_v3, %v32_v63  ;;  %1150 = vmatprep.mubr.msk.f32.mxu0 %vm42_vm1, %v238_v3 }
 0x1f5   :  { %1151 = vmatmul.mubr.msk.f32.vlgmr.msra.gmra.mrb[2].mxu0 %vm42_vm1, %v1454_v5 }
 0x1f6   :  { %1234 = vmatpush3.bf16.msra.mxu0 %v1231_v10 }
 0x1f7   :  { %1236 = vmatprep.subr.bf16.mxu0 %v1235_v13 }
 0x1fa   :  { %1238 = vmatpush3.bf16.msra.mxu0 %v1235_v13 }
 0x1fb   :  { %1245 = vmatprep.subr.bf16.mxu0 %v1345_v0 }
 0x2c8   :  { %v1152_v16 = vpop.f32.mrb[2].mxu0 }
 0x2c9   :  { %v333_v18 = vadd.f32 %v1152_v16, %v1045_v15  ;;  %v327_v19 = vpop.f32.mrb[3].mxu0 }
 0x2ca   :  { %v328_v21 = vadd.f32 %v1045_v15, %v327_v19 }
 0x2cb   :  { %v381_v22 = vmul.f32 %v333_v18, %v333_v18  ;;  %v356_v28 = vsel %vm42_vm1, %v333_v18, 0.0 }
 0x2cc   :  { %v343_v23 = vsub.f32 %v328_v21, %v328_v21  ;;  %v345_v25 = vsel %vm42_vm1, %v328_v21, 0.0  ;;  %v365_v26 = vmul.f32 %v328_v21, %v328_v21 }
 0x2cd   :  { %v348_v27 = vrot.slane %v345_v25, 4  ;;  %v383_v35 = vsel %vm42_vm1, %v381_v22, 0.0 }
 0x2ce   :  { %v355_v29 = vsel %vm42_vm1, %v343_v23, 0.0  ;;  %v367_v30 = vsel %vm42_vm1, %v365_v26, 0.0  ;;  %v380_v31 = vmul.f32 %v343_v23, %v343_v23 }
 0x2cf   :  { %v349_v32 = vadd.f32 %v348_v27, %v345_v25  ;;  %v357_v33 = vadd.f32 %v356_v28, %v355_v29  ;;  %v370_v34 = vrot.slane %v367_v30, 4  ;;  %v1048_v25 = vld [vmem:[#allocation2 + $0xa8] ss:$0 sm:$0xff]  ;;  %v1049_v27 = vld [vmem:[#allocation2 + $0xb0] ss:$0 sm:$0xff] }
 0x2d0   :  { %v382_v36 = vsel %vm42_vm1, %v380_v31, 0.0 }
 0x2d1   :  { %v350_v37 = vrot.slane %v349_v32, 2  ;;  %v358_v38 = vrot.slane %v357_v33, 4  ;;  %v371_v39 = vadd.f32 %v370_v34, %v367_v30  ;;  %v384_v40 = vadd.f32 %v383_v35, %v382_v36  ;;  %v759_v35 = vld [vmem:[#allocation2 + $0xe8] sm:$0xff] }
 0x2d3   :  { %v351_v41 = vadd.f32 %v350_v37, %v349_v32  ;;  %v359_v42 = vadd.f32 %v358_v38, %v357_v33  ;;  %v372_v43 = vrot.slane %v371_v39, 2  ;;  %v385_v44 = vrot.slane %v384_v40, 4  ;;  %v760_v37 = vld [vmem:[#allocation2 + $0xf0] sm:$0xff]  ;;  %v761_v38 = vld [vmem:[#allocation2 + $0xf8] sm:$0xff] }
 0x2d5   :  { %v352_v45 = vrot.slane %v351_v41, 1  ;;  %v360_v46 = vrot.slane %v359_v42, 2  ;;  %v373_v47 = vadd.f32 %v372_v43, %v371_v39  ;;  %v386_v48 = vadd.f32 %v385_v44, %v384_v40 }
 0x2d7   :  { %v353_v49 = vadd.f32 %v352_v45, %v351_v41  ;;  %v361_v50 = vadd.f32 %v360_v46, %v359_v42  ;;  %v374_v52 = vrot.slane %v373_v47, 1  ;;  %v387_v54 = vrot.slane %v386_v48, 2 }
 0x2d8   :  { %v1261_v41 = vpack.c.bf16 %v761_v38, %v760_v37 }
 0x2d9   :  { %v354_v55 = vmul.f32 0.125, %v353_v49  ;;  %v362_v56 = vrot.slane %v361_v50, 1  ;;  %v375_v57 = vadd.f32 %v374_v52, %v373_v47  ;;  %v388_v58 = vadd.f32 %v387_v54, %v386_v48 }
 0x2db   :  { %v363_v59 = vadd.f32 %v362_v56, %v361_v50  ;;  %v376_v60 = vmul.f32 0.125, %v375_v57  ;;  %v377_v63 = vmul.f32 %v354_v55, %v354_v55  ;;  %v389_v2 = vrot.slane %v388_v58, 1 }
 0x2dc   :  { %v399_v22 = vsub.f32 %v328_v21, %v354_v55  ;;  %v758_v21 = vld [vmem:[#allocation2 + $0xe0] sm:$0xff] }
 0x2dd   :  { %v378_v3 = vsub.f32 %v376_v60, %v377_v63  ;;  %v390_v4 = vadd.f32 %v389_v2, %v388_v58  ;;  %v364_v6 = vmul.f32 0.125, %v363_v59  ;;  %v1257_v36 = vpack.c.bf16 %v759_v35, %v758_v21  ;;  %v1059_v59 = vld [vmem:[#allocation2 + $0x100] ss:$0 sm:$0xff] }
 0x2df   :  { %v379_v7 = vmax.f32 %v378_v3, 0.0  ;;  %v391_v9 = vmul.f32 0.125, %v390_v4  ;;  %v392_v10 = vmul.f32 %v364_v6, %v364_v6  ;;  %v400_v12 = vsub.f32 %v333_v18, %v364_v6  ;;  %1258 = vmatprep.subr.bf16.mxu1 %v1257_v36 }
 0x2e1   :  { %v401_v13 = vadd.f32 1e-05, %v379_v7  ;;  %v393_v15 = vsub.f32 %v391_v9, %v392_v10 }
 0x2e3   :  { %1286 = vrsqrt.f32 %v401_v13  ;;  %v394_v16 = vmax.f32 %v393_v15, 0.0 }
 0x2e5   :  { %v402_v19 = vadd.f32 1e-05, %v394_v16 }
 0x2e7   :  { %1288 = vrsqrt.f32 %v402_v19 }
 0x2ed   :  { %v1287_v23 = vpop.eup %1286 }
 0x2ee   :  { %v405_v26 = vmul.f32 %v1287_v23, %v399_v22 }
 0x2f0   :  { %v412_v28 = vmul.f32 %v1048_v25, %v405_v26 }
 0x2f1   :  { %v1289_v29 = vpop.eup %1288 }
 0x2f2   :  { %v406_v30 = vmul.f32 %v1289_v29, %v400_v12  ;;  %v419_v31 = vadd.f32 %v1049_v27, %v412_v28 }
 0x2f4   :  { %v413_v32 = vmul.f32 %v1048_v25, %v406_v30  ;;  %v421_v33 = vmax.f32 %v419_v31, 0.0 }
 0x2f6   :  { %v420_v34 = vadd.f32 %v1049_v27, %v413_v32  ;;  %1161 = vmatprep.mubr.msk.f32.mxu0 %vm42_vm1, %v421_v33 }
 0x2f8   :  { %v422_v18 = vmax.f32 %v420_v34, 0.0 }
 0x2fa   :  { %1162 = vmatmul.mubr.msk.f32.vlgmr.msra.gmra.mrb[4].mxu0 %vm42_vm1, %v422_v18 }
 0x2fb   :  { %1247 = vmatpush3.bf16.msra.mxu0 %v1406_v11  ;;  %1191 = vmatprep.mubr.msk.f32.mxu0 %vm1346_vm0, %v1347_v1  ;;  %v1050_v11 = vld [vmem:[#allocation2 + $0xd8] ss:$0 sm:$0xff] }
 0x2fc   :  { %1248 = vmatprep.subr.bf16.mxu0 %v1345_v0 }
 0x2ff   :  { %1250 = vmatpush3.bf16.msra.mxu0 %v1410_v14 }
 0x300   :  { %1251 = vmatprep.subr.bf16.mxu0 %v1345_v0 }
 0x303   :  { %1253 = vmatpush3.bf16.msra.mxu0 %v1414_v17 }
 0x304   :  { %1254 = vmatprep.subr.bf16.mxu0 %v1345_v0 }
 0x307   :  { %1256 = vmatpush3.bf16.msra.mxu0 %v1418_v20 }
 0x3cd   :  { %v1163_v1 = vpop.f32.mrb[4].mxu0 }
 0x3ce   :  { %v510_v39 = vadd.f32 %v1163_v1, %v1050_v11  ;;  %v504_v40 = vpop.f32.mrb[5].mxu0 }
 0x3cf   :  { %v505_v14 = vadd.f32 %v1050_v11, %v504_v40 }
 0x3d0   :  { %1173 = vmatmul.mubr.msk.f32.vlgmr.msra.gmra.mrb[2].mxu1 %vm42_vm1, %v510_v39 }
 0x3d1   :  { %1260 = vmatpush3.bf16.msra.mxu1 %v1257_v36  ;;  %1202 = vmatprep.mubr.msk.f32.mxu1 %vm42_vm1, %v1402_v8  ;;  %v718_v0 = vsub.f32 %v505_v14, %v1402_v8 }
 0x3d2   :  { %1262 = vmatprep.subr.bf16.mxu1 %v1261_v41 }
 0x3d3   :  { %v719_v17 = vmul.f32 %v718_v0, %v718_v0 }
 0x3d5   :  { %1264 = vmatpush3.bf16.msra.mxu1 %v1261_v41  ;;  %v720_v20 = vsel %vm42_vm1, %v719_v17, 0.0 }
 0x3d6   :  { %721 = vadd.xlane.f32.xlu1 %v720_v20 }
 0x3d8   :  { %1203 = vmatmul.mubr.msk.f32.vlgmr.msra.gmra.mrb[4].mxu1 %vm42_vm1, %v510_v39 }
 0x463   :  { %v722_v42 = vpop.xlane.xlu1 %721 }
 0x464   :  { %v723_v43 = vrot.slane %v722_v42, 4 }
 0x466   :  { %v724_v44 = vadd.f32 %v723_v43, %v722_v42 }
 0x468   :  { %v725_v45 = vrot.slane %v724_v44, 2 }
 0x46a   :  { %v726_v46 = vadd.f32 %v725_v45, %v724_v44 }
 0x46c   :  { %v727_v47 = vrot.slane %v726_v46, 1 }
 0x46e   :  { %v728_v48 = vadd.f32 %v727_v47, %v726_v46 }
 0x470   :  { %1265 = vpush %v728_v48 }
 0x4a1   :  { %s1266_s1 = spop %1265 }
 0x4a2   :  { %s730_s3 = smul.f32 0.00390625, %s1266_s1 }
 0x4a3   :  { %v591_v49 = vpop.f32.mrb[2].mxu1 }
 0x4a4   :  { %1012 = sst [smem:[#allocation5 + $0x1]] %s730_s3  ;;  %v1484_v8 = vadd.f32 %v1422_v24, %v591_v49  ;;  %v1174_v50 = vpop.f32.mrb[3].mxu1 }
 0x4a6   :  { %v595_v52 = vsel %vm116_vm2, %v1484_v8, 0.0  ;;  %v603_v54 = vmul.f32 %v1484_v8, %v1484_v8 }
 0x4a7   :  { %v596_v55 = vrot.slane %v595_v52, 4 }
 0x4a8   :  { %v604_v56 = vsel %vm116_vm2, %v603_v54, 0.0 }
 0x4a9   :  { %v597_v57 = vadd.f32 %v596_v55, %v595_v52  ;;  %v605_v58 = vrot.slane %v604_v56, 4 }
 0x4ab   :  { %v598_v60 = vrot.slane %v597_v57, 2  ;;  %v606_v63 = vadd.f32 %v605_v58, %v604_v56  ;;  %v1204_v2 = vpop.f32.mrb[4].mxu1 }
 0x4ac   :  { %v1491_v3 = vadd.f32 %v1204_v2, %v1059_v59  ;;  %v832_v24 = vpop.f32.mrb[5].mxu1 }
 0x4ad   :  { %v599_v4 = vadd.f32 %v598_v60, %v597_v57  ;;  %v607_v6 = vrot.slane %v606_v63, 2  ;;  %v1493_v7 = vadd.f32 %v1059_v59, %v832_v24 }
 0x4ae   :  { %v881_v9 = vmul.f32 %v1491_v3, %v1491_v3  ;;  %v856_v16 = vsel %vm42_vm1, %v1491_v3, 0.0 }
 0x4af   :  { %v600_v10 = vrot.slane %v599_v4, 1  ;;  %v608_v12 = vadd.f32 %v607_v6, %v606_v63  ;;  %v843_v13 = vsub.f32 %v1493_v7, %v1493_v7  ;;  %v845_v15 = vsel %vm42_vm1, %v1493_v7, 0.0 }
 0x4b0   :  { %v848_v19 = vrot.slane %v845_v15, 4  ;;  %v865_v22 = vmul.f32 %v1493_v7, %v1493_v7  ;;  %v883_v28 = vsel %vm42_vm1, %v881_v9, 0.0 }
 0x4b1   :  { %v601_v23 = vadd.f32 %v600_v10, %v599_v4  ;;  %v609_v25 = vrot.slane %v608_v12, 1  ;;  %v855_v26 = vsel %vm42_vm1, %v843_v13, 0.0  ;;  %v880_v27 = vmul.f32 %v843_v13, %v843_v13 }
 0x4b2   :  { %v849_v29 = vadd.f32 %v848_v19, %v845_v15  ;;  %v857_v30 = vadd.f32 %v856_v16, %v855_v26  ;;  %v867_v31 = vsel %vm42_vm1, %v865_v22, 0.0 }
 0x4b3   :  { %v602_v32 = vmul.f32 0.125, %v601_v23  ;;  %v610_v33 = vadd.f32 %v609_v25, %v608_v12  ;;  %v870_v34 = vrot.slane %v867_v31, 4  ;;  %v882_v18 = vsel %vm42_vm1, %v880_v27, 0.0  ;;  %v1062_v27 = vld [vmem:[#allocation2 + $0x108] ss:$0 sm:$0xff] }
 0x4b4   :  { %v850_v21 = vrot.slane %v849_v29, 2  ;;  %v858_v35 = vrot.slane %v857_v30, 4  ;;  %v884_v36 = vadd.f32 %v883_v28, %v882_v18 }
 0x4b5   :  { %v611_v11 = vmul.f32 0.125, %v610_v33  ;;  %v612_v37 = vmul.f32 %v602_v32, %v602_v32  ;;  %v871_v38 = vadd.f32 %v870_v34, %v867_v31  ;;  %v615_v12 = vsub.f32 %v1484_v8, %v602_v32  ;;  %v1064_v33 = vld [vmem:[#allocation2 + $0x118] ss:$0 sm:$0xff] }
 0x4b6   :  { %v851_v1 = vadd.f32 %v850_v21, %v849_v29  ;;  %v859_v39 = vadd.f32 %v858_v35, %v857_v30  ;;  %v885_v40 = vrot.slane %v884_v36, 4  ;;  %v1063_v29 = vld [vmem:[#allocation2 + $0x110] ss:$0 sm:$0xff] }
 0x4b7   :  { %v613_v41 = vsub.f32 %v611_v11, %v612_v37  ;;  %v872_v14 = vrot.slane %v871_v38, 2  ;;  %v1065_v11 = vld [vmem:[#allocation2 + $0x120] ss:$0 sm:$0xff] }
 0x4b8   :  { %v852_v0 = vrot.slane %v851_v1, 1  ;;  %v860_v17 = vrot.slane %v859_v39, 2  ;;  %v886_v20 = vadd.f32 %v885_v40, %v884_v36 }
 0x4b9   :  { %v614_v42 = vmax.f32 %v613_v41, 0.0  ;;  %v873_v43 = vadd.f32 %v872_v14, %v871_v38 }
 0x4ba   :  { %v853_v44 = vadd.f32 %v852_v0, %v851_v1  ;;  %v887_v45 = vrot.slane %v886_v20, 2  ;;  %v861_v46 = vadd.f32 %v860_v17, %v859_v39 }
 0x4bb   :  { %v616_v47 = vadd.f32 1e-05, %v614_v42  ;;  %v874_v48 = vrot.slane %v873_v43, 1 }
 0x4bc   :  { %v854_v49 = vmul.f32 0.125, %v853_v44  ;;  %v888_v50 = vadd.f32 %v887_v45, %v886_v20  ;;  %v862_v52 = vrot.slane %v861_v46, 1 }
 0x4bd   :  { %1290 = vrsqrt.f32 %v616_v47  ;;  %v875_v54 = vadd.f32 %v874_v48, %v873_v43 }
 0x4be   :  { %v877_v55 = vmul.f32 %v854_v49, %v854_v49  ;;  %v889_v56 = vrot.slane %v888_v50, 1  ;;  %v863_v57 = vadd.f32 %v862_v52, %v861_v46  ;;  %v899_v26 = vsub.f32 %v1493_v7, %v854_v49 }
 0x4bf   :  { %v876_v58 = vmul.f32 0.125, %v875_v54 }
 0x4c0   :  { %v864_v59 = vmul.f32 0.125, %v863_v57  ;;  %v890_v60 = vadd.f32 %v889_v56, %v888_v50 }
 0x4c1   :  { %v878_v63 = vsub.f32 %v876_v58, %v877_v55 }
 0x4c2   :  { %v891_v2 = vmul.f32 0.125, %v890_v60  ;;  %v892_v24 = vmul.f32 %v864_v59, %v864_v59  ;;  %v900_v4 = vsub.f32 %v1491_v3, %v864_v59 }
 0x4c3   :  { %v879_v6 = vmax.f32 %v878_v63, 0.0 }
 0x4c4   :  { %v893_v9 = vsub.f32 %v891_v2, %v892_v24 }
 0x4c5   :  { %v901_v10 = vadd.f32 1e-05, %v879_v6 }
 0x4c6   :  { %v894_v13 = vmax.f32 %v893_v9, 0.0 }
 0x4c7   :  { %v1291_v15 = vpop.eup %1290  ;;  %1292 = vrsqrt.f32 %v901_v10 }
 0x4c8   :  { %v618_v16 = vmul.f32 %v1291_v15, %v615_v12  ;;  %v902_v19 = vadd.f32 1e-05, %v894_v13 }
 0x4ca   :  { %v624_v22 = vmul.f32 %v1427_v51, %v618_v16  ;;  %1294 = vrsqrt.f32 %v902_v19 }
 0x4cc   :  { %v630_v23 = vadd.f32 %v1429_v53, %v624_v22 }
 0x4ce   :  { %v631_v25 = vmax.f32 %v630_v23, 0.0 }
 0x4d0   :  { %1192 = vmatmul.mubr.msk.f32.vlgmr.msra.gmra.mrb[6].mxu0 %vm116_vm2, %v631_v25 }
 0x4d1   :  { %v1293_v3 = vpop.eup %1292 }
 0x4d2   :  { %v905_v28 = vmul.f32 %v1293_v3, %v899_v26 }
 0x4d4   :  { %v1295_v8 = vpop.eup %1294  ;;  %v912_v30 = vmul.f32 %v1062_v27, %v905_v28 }
 0x4d5   :  { %v906_v31 = vmul.f32 %v1295_v8, %v900_v4 }
 0x4d6   :  { %v919_v32 = vadd.f32 %v1063_v29, %v912_v30 }
 0x4d7   :  { %v913_v34 = vmul.f32 %v1062_v27, %v906_v31 }
 0x4d8   :  { %v921_v18 = vmax.f32 %v919_v32, 0.0 }
 0x4d9   :  { %v920_v51 = vadd.f32 %v1063_v29, %v913_v34 }
 0x4da   :  { %v929_v21 = vmul.f32 %v1064_v33, %v921_v18 }
 0x4db   :  { %v922_v35 = vmax.f32 %v920_v51, 0.0 }
 0x4dc   :  { %v931_v53 = vsel %vm42_vm1, %v929_v21, 0.0 }
 0x4dd   :  { %932 = vadd.xlane.f32.xlu0 %v931_v53  ;;  %v930_v7 = vmul.f32 %v1064_v33, %v922_v35 }
 0x4df   :  { %v934_v36 = vsel %vm42_vm1, %v930_v7, 0.0 }
 0x4e1   :  { %935 = vadd.xlane.f32.xlu0 %v934_v36 }
 0x56a   :  { %v933_v37 = vpop.xlane.xlu0 %932 }
 0x56b   :  { %v941_v38 = vadd.f32 %v1065_v11, %v933_v37 }
 0x56d   :  { %v944_v1 = vand.u32 2147483647, %v941_v38  ;;  %v943_v52 = vmax.f32 %v941_v38, 0.0 }
 0x56e   :  { %v936_v39 = vpop.xlane.xlu0 %935 }
 0x56f   :  { %v945_v40 = vsub.f32 0.0, %v944_v1  ;;  %v942_v14 = vadd.f32 %v1065_v11, %v936_v39 }
 0x571   :  { %v946_v41 = vmul.f32 1.442695, %v945_v40  ;;  %v971_v0 = vand.u32 2147483647, %v942_v14  ;;  %v970_v10 = vmax.f32 %v942_v14, 0.0 }
 0x573   :  { %1296 = vpow2.f32 %v946_v41  ;;  %v972_v17 = vsub.f32 0.0, %v971_v0 }
 0x575   :  { %v973_v42 = vmul.f32 1.442695, %v972_v17 }
 0x57d   :  { %v1297_v20 = vpop.eup %1296 }
 0x57e   :  { %v948_v43 = vadd.f32 1.0, %v1297_v20  ;;  %v951_v44 = vmul.f32 -0.5, %v1297_v20  ;;  %v954_v46 = vand.u32 2147483647, %v1297_v20 }
 0x580   :  { %1298 = vlog2.f32 %v948_v43  ;;  %v952_v45 = vadd.f32 1.0, %v951_v44  ;;  %vm955_vm4 = vcmp.lt.f32.partialorder %v954_v46, 0.0004427343 }
 0x581   :  { %1300 = vpow2.f32 %v973_v42 }
 0x582   :  { %v953_v50 = vmul.f32 %v1297_v20, %v952_v45 }
 0x58a   :  { %v1299_v47 = vpop.eup %1298 }
 0x58b   :  { %v1301_v48 = vpop.eup %1300  ;;  %v950_v49 = vmul.f32 0.6931472, %v1299_v47 }
 0x58c   :  { %v975_v56 = vadd.f32 1.0, %v1301_v48  ;;  %v978_v59 = vmul.f32 -0.5, %v1301_v48  ;;  %v981_v2 = vand.u32 2147483647, %v1301_v48 }
 0x58d   :  { %v956_v54 = vsel %vm955_vm4, %v953_v50, %v950_v49 }
 0x58e   :  { %v957_v55 = vadd.f32 %v956_v54, %v943_v52  ;;  %1302 = vlog2.f32 %v975_v56  ;;  %v979_v63 = vadd.f32 1.0, %v978_v59  ;;  %vm982_vm6 = vcmp.lt.f32.partialorder %v981_v2, 0.0004427343 }
 0x590   :  { %v958_v57 = vsub.f32 %v957_v55, %v941_v38  ;;  %v980_v4 = vmul.f32 %v1301_v48, %v979_v63 }
 0x592   :  { %v960_v58 = vsel %vm959_vm5, %v958_v57, 0.0 }
 0x593   :  { %961 = vadd.xlane.f32.xlu1 %v960_v58 }
 0x598   :  { %v1303_v60 = vpop.eup %1302 }
 0x599   :  { %v977_v24 = vmul.f32 0.6931472, %v1303_v60 }
 0x59b   :  { %v983_v9 = vsel %vm982_vm6, %v980_v4, %v977_v24 }
 0x59c   :  { %v984_v16 = vadd.f32 %v983_v9, %v970_v10 }
 0x59e   :  { %v997_v25 = vsub.f32 %v984_v16, %v942_v14 }
 0x5a0   :  { %v998_v3 = vsel %vm959_vm5, %v997_v25, 0.0 }
 0x5a3   :  { %v714_v6 = vpop.f32.mrb[6].mxu0 }
 0x5a4   :  { %v715_v12 = vadd.f32 %v1441_v62, %v714_v6  ;;  %v1193_v13 = vpop.f32.mrb[7].mxu0  ;;  %v985_v62 = vsel %vm959_vm5, %v984_v16, 0.0 }
 0x5a6   :  { %v731_v15 = vsub.f32 %v715_v12, %v1454_v5 }
 0x5a8   :  { %v732_v19 = vmul.f32 %v731_v15, %v731_v15 }
 0x5aa   :  { %v733_v22 = vsel %vm42_vm1, %v732_v19, 0.0  ;;  %v743_v23 = vsel %vm244_vm3, %v732_v19, 0.0 }
 0x5ab   :  { %734 = vadd.xlane.f32.xlu1 %v733_v22  ;;  %v744_v26 = vsel %vm42_vm1, %v743_v23, 0.0 }
 0x5ac   :  { %745 = vadd.xlane.f32.xlu0 %v744_v26 }
 0x5af   :  { %999 = vadd.xlane.f32.xlu1 %v998_v3 }
 0x5b0   :  { %986 = vadd.xlane.f32.xlu0 %v985_v62 }
 0x620   :  { %v962_v27 = vpop.xlane.xlu1 %961 }
 0x621   :  { %v963_v5 = vrot.slane %v962_v27, 4 }
 0x623   :  { %v964_v28 = vadd.f32 %v963_v5, %v962_v27 }
 0x625   :  { %v965_v8 = vrot.slane %v964_v28, 2 }
 0x627   :  { %v966_v35 = vadd.f32 %v965_v8, %v964_v28 }
 0x629   :  { %v967_v40 = vrot.slane %v966_v35, 1 }
 0x62b   :  { %v968_v43 = vadd.f32 %v967_v40, %v966_v35 }
 0x638   :  { %v735_v29 = vpop.xlane.xlu1 %734 }
 0x639   :  { %v736_v30 = vrot.slane %v735_v29, 4  ;;  %v746_v31 = vpop.xlane.xlu0 %745 }
 0x63a   :  { %v747_v61 = vrot.slane %v746_v31, 4 }
 0x63b   :  { %v737_v32 = vadd.f32 %v736_v30, %v735_v29 }
 0x63c   :  { %v748_v33 = vadd.f32 %v747_v61, %v746_v31  ;;  %v1000_v34 = vpop.xlane.xlu1 %999 }
 0x63d   :  { %v738_v18 = vrot.slane %v737_v32, 2  ;;  %v1001_v51 = vrot.slane %v1000_v34, 4  ;;  %v987_v21 = vpop.xlane.xlu0 %986 }
 0x63e   :  { %v749_v53 = vrot.slane %v748_v33, 2  ;;  %v988_v7 = vrot.slane %v987_v21, 4 }
 0x63f   :  { %v1002_v36 = vadd.f32 %v1001_v51, %v1000_v34  ;;  %v739_v11 = vadd.f32 %v738_v18, %v737_v32 }
 0x640   :  { %v989_v37 = vadd.f32 %v988_v7, %v987_v21  ;;  %v750_v38 = vadd.f32 %v749_v53, %v748_v33 }
 0x641   :  { %v1003_v1 = vrot.slane %v1002_v36, 2  ;;  %v740_v39 = vrot.slane %v739_v11, 1 }
 0x642   :  { %v990_v41 = vrot.slane %v989_v37, 2  ;;  %v751_v14 = vrot.slane %v750_v38, 1 }
 0x643   :  { %v1004_v0 = vadd.f32 %v1003_v1, %v1002_v36  ;;  %v741_v17 = vadd.f32 %v740_v39, %v739_v11 }
 0x644   :  { %v991_v20 = vadd.f32 %v990_v41, %v989_v37  ;;  %v752_v42 = vadd.f32 %v751_v14, %v750_v38 }
 0x645   :  { %1267 = vpush %v741_v17  ;;  %v1005_v44 = vrot.slane %v1004_v0, 1 }
 0x646   :  { %1269 = vpush %v752_v42  ;;  %v992_v45 = vrot.slane %v991_v20, 1 }
 0x647   :  { %1271 = vpush %v968_v43  ;;  %v1006_v46 = vadd.f32 %v1005_v44, %v1004_v0 }
 0x648   :  { %v993_v47 = vadd.f32 %v992_v45, %v991_v20 }
 0x64a   :  { %1273 = vpush %v993_v47 }
 0x64b   :  { %1275 = vpush %v1006_v46 }
 0x676   :  { %s1268_s7 = spop %1267 }
 0x677   :  { %s1270_s8 = spop %1269 }
 0x678   :  { %s754_s9 = smul.f32 0.0078125, %s1270_s8  ;;  %s755_s10 = ssub.f32 %s1268_s7, %s1270_s8 }
 0x679   :  { %s1272_s11 = spop %1271 }
 0x67a   :  { %s756_s12 = smul.f32 0.0078125, %s755_s10  ;;  %1014 = sst [smem:[#allocation5 + $0x2]] %s754_s9 }
 0x67b   :  { %s1274_s13 = spop %1273 }
 0x67c   :  { %1016 = sst [smem:[#allocation5 + $0x3]] %s756_s12  ;;  %s1276_s17 = spop %1275 }
 0x67d   :  { %s995_s18 = sadd.f32 %s1274_s13, %s1272_s11  ;;  %s1008_s19 = smul.f32 0.125, %s1276_s17 }
 0x67f   :  { %s996_s20 = smul.f32 0.0625, %s995_s18  ;;  %1010 = sst [smem:[#allocation5]] %s1008_s19 }
 0x681   :  { %1018 = sst [smem:[#allocation5 + $0x4]] %s996_s20 }
 0x682   :  { %1337 = shalt.err (!%p1334_p12)
}
 0x683   :  { %s1348_s22 = smov [#allocation5]  }
 0x684   :  { %1030 = dma.smem_to_vmem %s1348_s22, 16, %s1028_s16, [#allocation4]  }
 0x685   :  { %1340 = dma.done.wait [#allocation4], 16  }
 0x686   :  { %1341 = vsyncadd [#allocation4], 4294967280 }
 0x687   :  { %1036 = sfence }
 0x688   :  { %1037 = vsyncpa [#allocation3], 1 }
 0x689   :  { %1038 = vsyncpa [#allocation4], 1 }

</bundles_post_ra>
